<compile_context>
chip_gen: v7x
topology: tpu7x:2x2x1
jax: 0.10.0
libtpu: 0.0.40
codegen_flags: <defaults>
</compile_context>

<pallas_src>
import functools
from dataclasses import dataclass, field
from typing import List, Optional

import jax
import jax.numpy as jnp
from jax.experimental import pallas as pl
from jax.experimental.pallas import tpu as pltpu

LANE = 128  # TPU lane width


# ---------------------------------------------------------------------------
# net settings (mirrors the attributes used by the PyTorch module)
# ---------------------------------------------------------------------------
@dataclass
class NetSettings:
    input_dims: int = 2                       # (x, t) for diffusion-reaction PINN
    output_dims: int = 1
    hidden_neurons_list: List[int] = field(default_factory=lambda: [32, 32, 32])
    hidden_activation: str = "tanh"
    output_activation: Optional[str] = None   # falsy -> no output activation


def _apply_activation(y, name):
    if name == "tanh":
        return jnp.tanh(y)
    if name == "sin":
        return jnp.sin(y)
    if name == "relu":
        return jnp.maximum(y, 0.0)
    if name == "sigmoid(tanh)":
        return jax.nn.sigmoid(jnp.tanh(y))
    if name is None or name == "none":
        return y
    raise ValueError(f"Unsupported activation function: {name}")


def _round_up(n, m):
    return -(-n // m) * m


def _cdiv(a, b):
    return -(-a // b)


# ---------------------------------------------------------------------------
# fused whole-MLP Pallas kernel (one row tile of G packed row-groups per step)
# ---------------------------------------------------------------------------
def _mlp_fused_kernel(x_ref, w0_ref, b0_ref, ws_ref, bs_ref, wf_ref, bf_ref,
                      o_ref, *, n_hidden, hidden_act, output_act):
    # x_ref : (tm, Kin)   Kin = G*Din   packed row tile (group g -> cols [g*Din, (g+1)*Din))
    # w0_ref: (Kin, PAD)  first layer, group g weights placed in lanes [g*H, g*H+H)
    # b0_ref: (1, PAD)    bias replicated per lane-group
    # ws_ref: (n, PAD, PAD) hidden->hidden layers, block-diagonal per group
    # bs_ref: (n, 1, PAD)
    # wf_ref: (PAD, Gd)   final layer; group g block at rows [g*H,...), cols [g*Dout,...)
    # bf_ref: (1, Gd)
    # o_ref : (tm, Gd)    exactly the useful output bytes (no slab)
    kin = x_ref.shape[1]
    x = x_ref[...].astype(jnp.float32)

    # ---- first hidden layer ----
    if kin <= 16:
        # tiny K: VPU broadcast-FMAs seeded from the bias (f32 on all chips)
        h = x[:, 0:1] * w0_ref[0:1, :] + b0_ref[...]
        for k in range(1, kin):                               # static unrolled
            h = h + x[:, k:k + 1] * w0_ref[k:k + 1, :]
    else:
        h = jnp.dot(x.astype(w0_ref.dtype), w0_ref[...],
                    preferred_element_type=jnp.float32) + b0_ref[...]
    h = _apply_activation(h, hidden_act)

    # ---- hidden -> hidden layers (block-diagonal, VMEM-resident) ----
    mm_dtype = ws_ref.dtype                                   # f32 or bf16
    for l in range(n_hidden):                                 # static Python loop
        h = jnp.dot(h.astype(mm_dtype), ws_ref[l],
                    preferred_element_type=jnp.float32) + bs_ref[l]
        h = _apply_activation(h, hidden_act)

    # ---- final linear (+ optional output activation) ----
    y = jnp.dot(h.astype(wf_ref.dtype), wf_ref[...],
                preferred_element_type=jnp.float32) + bf_ref[...]
    if output_act is not None:
        y = _apply_activation(y, output_act)
    o_ref[...] = y.astype(o_ref.dtype)


def _choose_row_tiling(rp, cap):
    """rows-per-group rp -> (row tile, number of tiles)."""
    rp = max(rp, 8)
    if rp <= cap:
        return _round_up(rp, 8), 1            # single tile: no per-step overhead
    n_tiles = _round_up(_cdiv(rp, cap), 2)    # even tile count (v7x dual TC)
    tm = _round_up(_cdiv(rp, n_tiles), 8)
    return tm, n_tiles


# ---------------------------------------------------------------------------
# parameter init (deterministic, mimics torch.nn.Linear default U(-1/sqrt(fan_in), +))
# ---------------------------------------------------------------------------
def init_mlp_params(settings: NetSettings, key):
    dims = [settings.input_dims] + list(settings.hidden_neurons_list) + [settings.output_dims]
    params = []
    for i in range(len(dims) - 1):
        fan_in, fan_out = dims[i], dims[i + 1]
        key, kw, kb = jax.random.split(key, 3)
        bound = 1.0 / jnp.sqrt(float(fan_in))
        w = jax.random.uniform(kw, (fan_in, fan_out), jnp.float32, -bound, bound)
        b = jax.random.uniform(kb, (1, fan_out), jnp.float32, -bound, bound)
        params.append((w, b))
    return params


# ---------------------------------------------------------------------------
# forward pass: mirrors get_mlp_pinn.forward (single fused Pallas kernel)
# ---------------------------------------------------------------------------
def mlp_pinn_forward(params, x, settings: NetSettings, *,
                     use_bf16_matmul: bool = False, max_row_tile: int = 2048):
    N, din = x.shape
    L = len(params)
    assert L >= 2, "module always has >=1 hidden layer plus the final Linear"

    f32 = jnp.float32
    mm_dtype = jnp.bfloat16 if use_bf16_matmul else f32

    widths = [w.shape[1] for (w, _) in params]
    hidden_widths = widths[:-1]
    dout = widths[-1]
    h0 = hidden_widths[0]

    # lane packing factor: G independent row sub-batches share the 128 lanes
    if len(set(hidden_widths)) == 1 and h0 <= LANE:
        pad = LANE
        G = LANE // h0
    else:
        pad = _round_up(max(hidden_widths), LANE)
        G = 1

    # ---- first layer: per-group lane placement ----
    w0, b0 = params[0]
    kin = G * din
    w0p = jnp.zeros((kin, pad), f32)
    b0p = jnp.zeros((1, pad), f32)
    for g in range(G):
        w0p = w0p.at[g * din:(g + 1) * din, g * h0:g * h0 + h0].set(w0)
        b0p = b0p.at[:, g * h0:g * h0 + h0].set(b0.reshape(1, -1))

    # ---- hidden->hidden layers: block-diagonal per group ----
    hid_params = params[1:L - 1]
    n_hidden = len(hid_params)
    ws_list, bs_list = [], []
    for (w, b) in hid_params:
        wp = jnp.zeros((pad, pad), f32)
        bp = jnp.zeros((1, pad), f32)
        for g in range(G):
            r0, c0 = g * w.shape[0], g * w.shape[1]
            wp = wp.at[r0:r0 + w.shape[0], c0:c0 + w.shape[1]].set(w)
            bp = bp.at[:, c0:c0 + w.shape[1]].set(b.reshape(1, -1))
        ws_list.append(wp)
        bs_list.append(bp)
    if n_hidden == 0:
        ws = jnp.zeros((1, pad, pad), mm_dtype)   # dummy, never read (static loop of 0)
        bs = jnp.zeros((1, 1, pad), f32)
    else:
        ws = jnp.stack(ws_list).astype(mm_dtype)  # (n_hidden, PAD, PAD)
        bs = jnp.stack(bs_list)                   # (n_hidden, 1, PAD)

    # ---- final layer: group g block -> output columns [g*Dout, (g+1)*Dout) ----
    wF, bF = params[-1]
    h_last = wF.shape[0]
    gd = G * dout
    wfp = jnp.zeros((pad, gd), f32)
    bfp = jnp.zeros((1, gd), f32)
    for g in range(G):
        wfp = wfp.at[g * h_last:g * h_last + h_last, g * dout:(g + 1) * dout].set(wF)
        bfp = bfp.at[:, g * dout:(g + 1) * dout].set(bF.reshape(1, -1))
    wfp = wfp.astype(mm_dtype)

    # ---- pack rows: split N into G contiguous chunks, interleave along lanes ----
    rp_raw = _cdiv(N, G)
    tm, n_tiles = _choose_row_tiling(rp_raw, max_row_tile)
    rp = tm * n_tiles
    n_pad = rp * G
    xpad = jnp.zeros((n_pad, din), f32).at[:N].set(x.astype(f32))
    xg = xpad.reshape(G, rp, din).transpose(1, 0, 2).reshape(rp, kin)

    out_act = settings.output_activation if settings.output_activation else None
    kernel = functools.partial(
        _mlp_fused_kernel,
        n_hidden=n_hidden,
        hidden_act=settings.hidden_activation,
        output_act=out_act,
    )

    out = pl.pallas_call(
        kernel,
        out_shape=jax.ShapeDtypeStruct((rp, gd), jnp.float32),
        grid_spec=pltpu.PrefetchScalarGridSpec(
            num_scalar_prefetch=0,
            grid=(n_tiles,),
            in_specs=[
                pl.BlockSpec((tm, kin), lambda i: (i, 0)),               # packed rows
                pl.BlockSpec((kin, pad), lambda i: (0, 0)),              # resident params
                pl.BlockSpec((1, pad), lambda i: (0, 0)),
                pl.BlockSpec((ws.shape[0], pad, pad), lambda i: (0, 0, 0)),
                pl.BlockSpec((bs.shape[0], 1, pad), lambda i: (0, 0, 0)),
                pl.BlockSpec((pad, gd), lambda i: (0, 0)),
                pl.BlockSpec((1, gd), lambda i: (0, 0)),
            ],
            out_specs=pl.BlockSpec((tm, gd), lambda i: (i, 0)),          # only useful bytes
        ),
        compiler_params=pltpu.CompilerParams(
            dimension_semantics=("parallel",),
            vmem_limit_bytes=32 * 1024 * 1024,
        ),
    )(xg, w0p, b0p, ws, bs, wfp, bfp)

    # unpack groups back to the original row order
    y = out.reshape(rp, G, dout).transpose(1, 0, 2).reshape(rp * G, dout)
    return y[:N]


# pure-JAX f32 reference for correctness checks
def mlp_pinn_reference(params, x, settings: NetSettings):
    h = x
    for i in range(len(params) - 1):
        w, b = params[i]
        h = _apply_activation(h @ w + b, settings.hidden_activation)
    w, b = params[-1]
    h = h @ w + b
    if settings.output_activation:
        h = _apply_activation(h, settings.output_activation)
    return h


if __name__ == "__main__":
    settings = NetSettings(
        input_dims=2,
        output_dims=1,
        hidden_neurons_list=[32, 32, 32],
        hidden_activation="tanh",
        output_activation=None,
    )

    key = jax.random.PRNGKey(0)
    key, kx1, kx2, kx3, kx4 = jax.random.split(key, 5)
    params = init_mlp_params(settings, key)

    # case 1: N = 256 collocation points (single tile, 4-way lane packing)
    x1 = jax.random.normal(kx1, (256, settings.input_dims), jnp.float32)
    y1 = jax.block_until_ready(mlp_pinn_forward(params, x1, settings))
    y1_ref = mlp_pinn_reference(params, x1, settings)
    assert y1.shape == (256, settings.output_dims)
    assert jnp.allclose(y1, y1_ref, atol=1e-5, rtol=1e-4), "mismatch vs reference (N=256)"

    # case 2: N = 200 (not a multiple of tile/group -> exercises tail padding)
    x2 = jax.random.normal(kx2, (200, settings.input_dims), jnp.float32)
    y2 = jax.block_until_ready(mlp_pinn_forward(params, x2, settings))
    y2_ref = mlp_pinn_reference(params, x2, settings)
    assert y2.shape == (200, settings.output_dims)
    assert jnp.allclose(y2, y2_ref, atol=1e-5, rtol=1e-4), "mismatch vs reference (N=200)"

    # case 3: N = 1024 with a small forced tile -> multi-tile (even) grid path
    x3 = jax.random.normal(kx3, (1024, settings.input_dims), jnp.float32)
    y3 = jax.block_until_ready(mlp_pinn_forward(params, x3, settings, max_row_tile=64))
    y3_ref = mlp_pinn_reference(params, x3, settings)
    assert y3.shape == (1024, settings.output_dims)
    assert jnp.allclose(y3, y3_ref, atol=1e-5, rtol=1e-4), "mismatch vs reference (N=1024)"

    # case 4: output activation path (sigmoid(tanh))
    settings_sig = NetSettings(
        input_dims=2, output_dims=1, hidden_neurons_list=[32, 32, 32],
        hidden_activation="tanh", output_activation="sigmoid(tanh)",
    )
    x4 = jax.random.normal(kx4, (128, settings.input_dims), jnp.float32)
    y4 = jax.block_until_ready(mlp_pinn_forward(params, x4, settings_sig))
    y4_ref = mlp_pinn_reference(params, x4, settings_sig)
    assert y4.shape == (128, settings.output_dims)
    assert jnp.allclose(y4, y4_ref, atol=1e-5, rtol=1e-4), "mismatch vs reference (output act)"

    # case 5: bf16 MXU path (v6e/v7x lever) -- looser tolerance vs f32 reference
    y5 = jax.block_until_ready(mlp_pinn_forward(params, x1, settings, use_bf16_matmul=True))
    assert y5.shape == (256, settings.output_dims)
    assert jnp.allclose(y5, y1_ref, atol=5e-2, rtol=5e-2), "mismatch vs reference (bf16)"

    print("KERNEL_OK")
</pallas_src>

<mosaic_0001>
module attributes {stable_mosaic.version = 11 : i64} {
  func.func @_mlp_fused_kernel(%arg0: i32, %arg1: memref<64x8xf32, #tpu.memory_space<vmem>>, %arg2: memref<8x128xf32, #tpu.memory_space<vmem>>, %arg3: memref<1x128xf32, #tpu.memory_space<vmem>>, %arg4: memref<2x128x128xf32, #tpu.memory_space<vmem>>, %arg5: memref<2x1x128xf32, #tpu.memory_space<vmem>>, %arg6: memref<128x4xf32, #tpu.memory_space<vmem>>, %arg7: memref<1x4xf32, #tpu.memory_space<vmem>>, %arg8: memref<64x4xf32, #tpu.memory_space<vmem>>) attributes {dimension_semantics = [#tpu.dimension_semantics<parallel>], iteration_bounds = array<i64: 1>, scalar_prefetch = 0 : i64, scratch_operands = 0 : i64, tpu.core_type = #tpu.core_type<tc>, window_params = [{transform_indices = @transform_0, window_bounds = array<i64: 64, 8>}, {pipeline_mode = #tpu.pipeline_mode<synchronous>, transform_indices = @transform_1, window_bounds = array<i64: 8, 128>}, {pipeline_mode = #tpu.pipeline_mode<synchronous>, transform_indices = @transform_2, window_bounds = array<i64: 1, 128>}, {pipeline_mode = #tpu.pipeline_mode<synchronous>, transform_indices = @transform_3, window_bounds = array<i64: 2, 128, 128>}, {pipeline_mode = #tpu.pipeline_mode<synchronous>, transform_indices = @transform_4, window_bounds = array<i64: 2, 1, 128>}, {pipeline_mode = #tpu.pipeline_mode<synchronous>, transform_indices = @transform_5, window_bounds = array<i64: 128, 4>}, {pipeline_mode = #tpu.pipeline_mode<synchronous>, transform_indices = @transform_6, window_bounds = array<i64: 1, 4>}, {transform_indices = @transform_7, window_bounds = array<i64: 64, 4>}]} {
    %c0 = arith.constant 0 : index
    %c0_0 = arith.constant 0 : index
    %0 = vector.load %arg1[%c0, %c0_0] : memref<64x8xf32, #tpu.memory_space<vmem>>, vector<64x8xf32>
    %1 = vector.extract_strided_slice %0 {offsets = [0, 0], sizes = [64, 1], strides = [1, 1]} : vector<64x8xf32> to vector<64x1xf32>
    %c0_1 = arith.constant 0 : index
    %c0_2 = arith.constant 0 : index
    %2 = vector.load %arg2[%c0_1, %c0_2] : memref<8x128xf32, #tpu.memory_space<vmem>>, vector<1x128xf32>
    %3 = vector.broadcast %1 : vector<64x1xf32> to vector<64x128xf32>
    %4 = vector.broadcast %2 : vector<1x128xf32> to vector<64x128xf32>
    %5 = arith.mulf %3, %4 : vector<64x128xf32>
    %c0_3 = arith.constant 0 : index
    %c0_4 = arith.constant 0 : index
    %6 = vector.load %arg3[%c0_3, %c0_4] : memref<1x128xf32, #tpu.memory_space<vmem>>, vector<1x128xf32>
    %7 = vector.broadcast %6 : vector<1x128xf32> to vector<64x128xf32>
    %8 = arith.addf %5, %7 : vector<64x128xf32>
    %9 = vector.extract_strided_slice %0 {offsets = [0, 1], sizes = [64, 1], strides = [1, 1]} : vector<64x8xf32> to vector<64x1xf32>
    %c1 = arith.constant 1 : index
    %c0_5 = arith.constant 0 : index
    %10 = vector.load %arg2[%c1, %c0_5] : memref<8x128xf32, #tpu.memory_space<vmem>>, vector<1x128xf32>
    %11 = vector.broadcast %9 : vector<64x1xf32> to vector<64x128xf32>
    %12 = vector.broadcast %10 : vector<1x128xf32> to vector<64x128xf32>
    %13 = arith.mulf %11, %12 : vector<64x128xf32>
    %14 = arith.addf %8, %13 : vector<64x128xf32>
    %15 = vector.extract_strided_slice %0 {offsets = [0, 2], sizes = [64, 1], strides = [1, 1]} : vector<64x8xf32> to vector<64x1xf32>
    %c2 = arith.constant 2 : index
    %c0_6 = arith.constant 0 : index
    %16 = vector.load %arg2[%c2, %c0_6] : memref<8x128xf32, #tpu.memory_space<vmem>>, vector<1x128xf32>
    %17 = vector.broadcast %15 : vector<64x1xf32> to vector<64x128xf32>
    %18 = vector.broadcast %16 : vector<1x128xf32> to vector<64x128xf32>
    %19 = arith.mulf %17, %18 : vector<64x128xf32>
    %20 = arith.addf %14, %19 : vector<64x128xf32>
    %21 = vector.extract_strided_slice %0 {offsets = [0, 3], sizes = [64, 1], strides = [1, 1]} : vector<64x8xf32> to vector<64x1xf32>
    %c3 = arith.constant 3 : index
    %c0_7 = arith.constant 0 : index
    %22 = vector.load %arg2[%c3, %c0_7] : memref<8x128xf32, #tpu.memory_space<vmem>>, vector<1x128xf32>
    %23 = vector.broadcast %21 : vector<64x1xf32> to vector<64x128xf32>
    %24 = vector.broadcast %22 : vector<1x128xf32> to vector<64x128xf32>
    %25 = arith.mulf %23, %24 : vector<64x128xf32>
    %26 = arith.addf %20, %25 : vector<64x128xf32>
    %27 = vector.extract_strided_slice %0 {offsets = [0, 4], sizes = [64, 1], strides = [1, 1]} : vector<64x8xf32> to vector<64x1xf32>
    %c4 = arith.constant 4 : index
    %c0_8 = arith.constant 0 : index
    %28 = vector.load %arg2[%c4, %c0_8] : memref<8x128xf32, #tpu.memory_space<vmem>>, vector<1x128xf32>
    %29 = vector.broadcast %27 : vector<64x1xf32> to vector<64x128xf32>
    %30 = vector.broadcast %28 : vector<1x128xf32> to vector<64x128xf32>
    %31 = arith.mulf %29, %30 : vector<64x128xf32>
    %32 = arith.addf %26, %31 : vector<64x128xf32>
    %33 = vector.extract_strided_slice %0 {offsets = [0, 5], sizes = [64, 1], strides = [1, 1]} : vector<64x8xf32> to vector<64x1xf32>
    %c5 = arith.constant 5 : index
    %c0_9 = arith.constant 0 : index
    %34 = vector.load %arg2[%c5, %c0_9] : memref<8x128xf32, #tpu.memory_space<vmem>>, vector<1x128xf32>
    %35 = vector.broadcast %33 : vector<64x1xf32> to vector<64x128xf32>
    %36 = vector.broadcast %34 : vector<1x128xf32> to vector<64x128xf32>
    %37 = arith.mulf %35, %36 : vector<64x128xf32>
    %38 = arith.addf %32, %37 : vector<64x128xf32>
    %39 = vector.extract_strided_slice %0 {offsets = [0, 6], sizes = [64, 1], strides = [1, 1]} : vector<64x8xf32> to vector<64x1xf32>
    %c6 = arith.constant 6 : index
    %c0_10 = arith.constant 0 : index
    %40 = vector.load %arg2[%c6, %c0_10] : memref<8x128xf32, #tpu.memory_space<vmem>>, vector<1x128xf32>
    %41 = vector.broadcast %39 : vector<64x1xf32> to vector<64x128xf32>
    %42 = vector.broadcast %40 : vector<1x128xf32> to vector<64x128xf32>
    %43 = arith.mulf %41, %42 : vector<64x128xf32>
    %44 = arith.addf %38, %43 : vector<64x128xf32>
    %45 = vector.extract_strided_slice %0 {offsets = [0, 7], sizes = [64, 1], strides = [1, 1]} : vector<64x8xf32> to vector<64x1xf32>
    %c7 = arith.constant 7 : index
    %c0_11 = arith.constant 0 : index
    %46 = vector.load %arg2[%c7, %c0_11] : memref<8x128xf32, #tpu.memory_space<vmem>>, vector<1x128xf32>
    %47 = vector.broadcast %45 : vector<64x1xf32> to vector<64x128xf32>
    %48 = vector.broadcast %46 : vector<1x128xf32> to vector<64x128xf32>
    %49 = arith.mulf %47, %48 : vector<64x128xf32>
    %50 = arith.addf %44, %49 : vector<64x128xf32>
    %51 = math.tanh %50 : vector<64x128xf32>
    %c0_12 = arith.constant 0 : index
    %c0_13 = arith.constant 0 : index
    %c0_14 = arith.constant 0 : index
    %52 = vector.load %arg4[%c0_12, %c0_13, %c0_14] : memref<2x128x128xf32, #tpu.memory_space<vmem>>, vector<1x128x128xf32>
    %53 = vector.shape_cast %52 : vector<1x128x128xf32> to vector<128x128xf32>
    %cst = arith.constant dense<0.000000e+00> : vector<64x128xf32>
    %54 = tpu.matmul %51, %53, %cst {dimension_numbers = #tpu.dot_dimension_numbers<[1], [0], [0], [1], [0, 0, 1, 1], [], []>} : vector<64x128xf32>, vector<128x128xf32>, vector<64x128xf32> -> vector<64x128xf32>
    %c0_15 = arith.constant 0 : index
    %c0_16 = arith.constant 0 : index
    %c0_17 = arith.constant 0 : index
    %55 = vector.load %arg5[%c0_15, %c0_16, %c0_17] : memref<2x1x128xf32, #tpu.memory_space<vmem>>, vector<1x1x128xf32>
    %56 = vector.shape_cast %55 : vector<1x1x128xf32> to vector<1x128xf32>
    %57 = vector.broadcast %56 : vector<1x128xf32> to vector<64x128xf32>
    %58 = arith.addf %54, %57 : vector<64x128xf32>
    %59 = math.tanh %58 : vector<64x128xf32>
    %c1_18 = arith.constant 1 : index
    %c0_19 = arith.constant 0 : index
    %c0_20 = arith.constant 0 : index
    %60 = vector.load %arg4[%c1_18, %c0_19, %c0_20] : memref<2x128x128xf32, #tpu.memory_space<vmem>>, vector<1x128x128xf32>
    %61 = vector.shape_cast %60 : vector<1x128x128xf32> to vector<128x128xf32>
    %cst_21 = arith.constant dense<0.000000e+00> : vector<64x128xf32>
    %62 = tpu.matmul %59, %61, %cst_21 {dimension_numbers = #tpu.dot_dimension_numbers<[1], [0], [0], [1], [0, 0, 1, 1], [], []>} : vector<64x128xf32>, vector<128x128xf32>, vector<64x128xf32> -> vector<64x128xf32>
    %c1_22 = arith.constant 1 : index
    %c0_23 = arith.constant 0 : index
    %c0_24 = arith.constant 0 : index
    %63 = vector.load %arg5[%c1_22, %c0_23, %c0_24] : memref<2x1x128xf32, #tpu.memory_space<vmem>>, vector<1x1x128xf32>
    %64 = vector.shape_cast %63 : vector<1x1x128xf32> to vector<1x128xf32>
    %65 = vector.broadcast %64 : vector<1x128xf32> to vector<64x128xf32>
    %66 = arith.addf %62, %65 : vector<64x128xf32>
    %67 = math.tanh %66 : vector<64x128xf32>
    %c0_25 = arith.constant 0 : index
    %c0_26 = arith.constant 0 : index
    %68 = vector.load %arg6[%c0_25, %c0_26] : memref<128x4xf32, #tpu.memory_space<vmem>>, vector<128x4xf32>
    %cst_27 = arith.constant dense<0.000000e+00> : vector<64x4xf32>
    %69 = tpu.matmul %67, %68, %cst_27 {dimension_numbers = #tpu.dot_dimension_numbers<[1], [0], [0], [1], [0, 0, 1, 1], [], []>} : vector<64x128xf32>, vector<128x4xf32>, vector<64x4xf32> -> vector<64x4xf32>
    %c0_28 = arith.constant 0 : index
    %c0_29 = arith.constant 0 : index
    %70 = vector.load %arg7[%c0_28, %c0_29] : memref<1x4xf32, #tpu.memory_space<vmem>>, vector<1x4xf32>
    %71 = vector.broadcast %70 : vector<1x4xf32> to vector<64x4xf32>
    %72 = arith.addf %69, %71 : vector<64x4xf32>
    %c0_30 = arith.constant 0 : index
    %c0_31 = arith.constant 0 : index
    %73 = vector.load %arg8[%c0_30, %c0_31] : memref<64x4xf32, #tpu.memory_space<vmem>>, vector<64x4xf32>
    tpu.vector_store %arg8[%c0_30, %c0_31], %72 {strides = array<i32>} : memref<64x4xf32, #tpu.memory_space<vmem>>, vector<64x4xf32>,
    return
  }
  func.func @transform_0(%arg0: i32) -> (i32, i32) {
    %c0_i32 = arith.constant 0 : i32
    %c0_i32_0 = arith.constant 0 : i32
    return %arg0, %c0_i32 : i32, i32
  }
  func.func @transform_1(%arg0: i32) -> (i32, i32) {
    %c0_i32 = arith.constant 0 : i32
    %c0_i32_0 = arith.constant 0 : i32
    %c0_i32_1 = arith.constant 0 : i32
    return %c0_i32, %c0_i32_0 : i32, i32
  }
  func.func @transform_2(%arg0: i32) -> (i32, i32) {
    %c0_i32 = arith.constant 0 : i32
    %c0_i32_0 = arith.constant 0 : i32
    %c0_i32_1 = arith.constant 0 : i32
    return %c0_i32, %c0_i32_0 : i32, i32
  }
  func.func @transform_3(%arg0: i32) -> (i32, i32, i32) {
    %c0_i32 = arith.constant 0 : i32
    %c0_i32_0 = arith.constant 0 : i32
    %c0_i32_1 = arith.constant 0 : i32
    %c0_i32_2 = arith.constant 0 : i32
    return %c0_i32, %c0_i32_0, %c0_i32_1 : i32, i32, i32
  }
  func.func @transform_4(%arg0: i32) -> (i32, i32, i32) {
    %c0_i32 = arith.constant 0 : i32
    %c0_i32_0 = arith.constant 0 : i32
    %c0_i32_1 = arith.constant 0 : i32
    %c0_i32_2 = arith.constant 0 : i32
    return %c0_i32, %c0_i32_0, %c0_i32_1 : i32, i32, i32
  }
  func.func @transform_5(%arg0: i32) -> (i32, i32) {
    %c0_i32 = arith.constant 0 : i32
    %c0_i32_0 = arith.constant 0 : i32
    %c0_i32_1 = arith.constant 0 : i32
    return %c0_i32, %c0_i32_0 : i32, i32
  }
  func.func @transform_6(%arg0: i32) -> (i32, i32) {
    %c0_i32 = arith.constant 0 : i32
    %c0_i32_0 = arith.constant 0 : i32
    %c0_i32_1 = arith.constant 0 : i32
    return %c0_i32, %c0_i32_0 : i32, i32
  }
  func.func @transform_7(%arg0: i32) -> (i32, i32) {
    %c0_i32 = arith.constant 0 : i32
    %c0_i32_0 = arith.constant 0 : i32
    return %arg0, %c0_i32 : i32, i32
  }
}

</mosaic_0001>

<bundles_post_ra>
// kernel: tpu_custom_call.1
= control target key start
LH: loop header
LB: loop body
LE: loop exit
PB: predicated region body
PF: predicated region fallthrough
CT: control target
= control target key end

     0   :  { %12 = vsyncpa [#allocation3], 0  ;;  %s1367_s24 = smov [#allocation2]   ;;  %s1844_s0 = inlined_call_operand.vmem [shape: f32[64,8], index: 0, kind: input, shape index: {}]   ;;  %s1845_s1 = inlined_call_operand.vmem [shape: f32[8,128], index: 1, kind: input, shape index: {}]   ;;  %s1846_s2 = inlined_call_operand.vmem [shape: f32[1,128], index: 2, kind: input, shape index: {}]   ;;  %s1847_s3 = inlined_call_operand.hbm [shape: f32[2,128,128], index: 3, kind: input, shape index: {}]   ;;  %s1848_s4 = inlined_call_operand.vmem [shape: f32[2,1,128], index: 4, kind: input, shape index: {}]   ;;  %s1849_s5 = inlined_call_operand.vmem [shape: f32[128,4], index: 5, kind: input, shape index: {}]   ;;  %s1850_s6 = inlined_call_operand.vmem [shape: f32[1,4], index: 6, kind: input, shape index: {}]   ;;  %s1851_s7 = inlined_call_operand.vmem [shape: f32[64,4], index: 7, kind: output, shape index: {}]  }
   0x1   :  { %s24_s25 = sshll.u32 %s1367_s24, 4  ;;  %s1343_s28 = scalar_lea.hbm %s1847_s3, 4096  ;;  %s25_s25 = int_to_ptr.vmem [resolvable:$true] %s24_s25 }
   0x2   :  { %p1344_p0 = scmp.ne.s32.totalorder %s1847_s3, %s1343_s28  ;;  %p1347_p1 = scmp.lt.u32.totalorder %s1343_s28, %s1847_s3 }
   0x4   :  { %p1349_p2 = pnand %p1347_p1, %p1344_p0 }
   0x6   :  { %1352 = shalt.err (!%p1349_p2)
}
   0x7   :  { %s1353_s10 = scalar_lea.vmem %s25_s25, 4096  ;;  %p1358_p4 = scmp.lt.s32.totalorder %s25_s25, %s25_s25 }
   0x8   :  { %p1354_p3 = scmp.ne.s32.totalorder %s25_s25, %s1353_s10  ;;  %p1359_p5 = scmp.lt.s32.totalorder %s1353_s10, %s1353_s10 }
   0xa   :  { %p1360_p6 = por %p1359_p5, %p1358_p4 }
   0xc   :  { %p1361_p7 = pnand %p1360_p6, %p1354_p3 }
   0xe   :  { %1364 = shalt.err (!%p1361_p7)
}
   0xf   :  { %s1368_s11 = smov 128   ;;  %s1369_s12 = smov 8  }
  0x10   :  { %30 = dma.hbm_to_vmem [thread:$0]  %s1847_s3, 4096, %s25_s25, [#allocation3], %s1368_s11, %s1368_s11, %s1369_s12  }
  0x11   :  { %1365 = dma.done.wait [#allocation3], 4096  }
  0x12   :  { %1366 = vsyncadd [#allocation3], 4294963200  ;;  %v1370_v0 = vmov 1   ;;  %v1371_v1 = vmov 0   ;;  %v1435_v2 = vld [vmem:[%s1844_s0] sm:$0xff]  ;;  %v1442_v3 = vld [vmem:[%s1844_s0 + $0x8] sm:$0xff] }
  0x13   :  { %1252 = vset.pattern.permute.xlu1 %v1370_v0  ;;  %1251 = vset.pattern.permute.xlu0 %v1371_v1  ;;  %v1449_v4 = vld [vmem:[%s1844_s0 + $0x10] sm:$0xff]  ;;  %v1372_v5 = vmov 2   ;;  %v1457_v6 = vld [vmem:[%s1844_s0 + $0x18] sm:$0xff]  ;;  %v1373_v8 = vmov 3   ;;  %v1477_v9 = vld [vmem:[%s1844_s0 + $0x20] sm:$0xff]  ;;  %v1374_v12 = vmov 7  }
  0x14   :  { %118 = vperm.xlu1 %1252, %v1435_v2   ;;  %51 = vperm.xlu0 %1251, %v1435_v2   ;;  %v1464_v7 = vld [vmem:[%s1844_s0 + $0x30] sm:$0xff]  ;;  %v1488_v10 = vld [vmem:[%s1844_s0 + $0x28] sm:$0xff]  ;;  %v1497_v11 = vld [vmem:[%s1844_s0 + $0x38] sm:$0xff]  ;;  %v1375_v13 = vmov 4   ;;  %v1376_v14 = vmov 5   ;;  %v1377_v15 = vmov 6  }
  0x15   :  { %v495_v16 = vld [vmem:[#allocation2] sm:$0xff]  ;;  %v496_v17 = vld [vmem:[#allocation2 + $0x8] sm:$0xff]  ;;  %v497_v19 = vld [vmem:[#allocation2 + $0x10] sm:$0xff]  ;;  %vm897_vm0 = vcmask 31744  }
  0x16   :  { %v1128_v18 = vpack.c.bf16 %v496_v17, %v495_v16  ;;  %v498_v20 = vld [vmem:[#allocation2 + $0x18] sm:$0xff]  ;;  %v499_v22 = vld [vmem:[#allocation2 + $0x20] sm:$0xff]  ;;  %v500_v23 = vld [vmem:[#allocation2 + $0x28] sm:$0xff] }
  0x17   :  { %v1132_v21 = vpack.c.bf16 %v498_v20, %v497_v19  ;;  %v1136_v24 = vpack.c.bf16 %v500_v23, %v499_v22  ;;  %v501_v25 = vld [vmem:[#allocation2 + $0x30] sm:$0xff]  ;;  %v502_v26 = vld [vmem:[#allocation2 + $0x38] sm:$0xff]  ;;  %v503_v28 = vld [vmem:[#allocation2 + $0x40] sm:$0xff] }
  0x18   :  { %122 = vperm.xlu1 %1252, %v1442_v3   ;;  %56 = vperm.xlu0 %1251, %v1442_v3   ;;  %v1140_v27 = vpack.c.bf16 %v502_v26, %v501_v25  ;;  %v504_v29 = vld [vmem:[#allocation2 + $0x48] sm:$0xff]  ;;  %v505_v31 = vld [vmem:[#allocation2 + $0x50] sm:$0xff]  ;;  %v506_v32 = vld [vmem:[#allocation2 + $0x58] sm:$0xff] }
  0x19   :  { %1129 = vmatprep.subr.bf16.mxu0 %v1128_v18  ;;  %v1144_v30 = vpack.c.bf16 %v504_v29, %v503_v28  ;;  %v1148_v33 = vpack.c.bf16 %v506_v32, %v505_v31  ;;  %v507_v34 = vld [vmem:[#allocation2 + $0x60] sm:$0xff]  ;;  %v508_v35 = vld [vmem:[#allocation2 + $0x68] sm:$0xff]  ;;  %v509_v37 = vld [vmem:[#allocation2 + $0x70] sm:$0xff] }
  0x1a   :  { %1131 = vmatpush3.bf16.msra.mxu0 %v1128_v18  ;;  %v1152_v36 = vpack.c.bf16 %v508_v35, %v507_v34  ;;  %v510_v38 = vld [vmem:[#allocation2 + $0x78] sm:$0xff]  ;;  %v1555_v40 = vld [vmem:[%s1845_s1] ss:$0 sm:$0xff]  ;;  %v1561_v41 = vld [vmem:[%s1845_s1 + $0x1] ss:$0 sm:$0xff] }
  0x1b   :  { %1133 = vmatprep.subr.bf16.mxu0 %v1132_v21  ;;  %v1156_v39 = vpack.c.bf16 %v510_v38, %v509_v37  ;;  %v1566_v43 = vld [vmem:[%s1846_s2] ss:$0 sm:$0xff]  ;;  %v1581_v51 = vld [vmem:[%s1845_s1 + $0x2] ss:$0 sm:$0xff]  ;;  %v1615_v20 = vld [vmem:[%s1845_s1 + $0x3] ss:$0 sm:$0xff] }
  0x1c   :  { %1253 = vset.pattern.permute.xlu1 %v1372_v5  ;;  %61 = vperm.xlu0 %1251, %v1449_v4  }
  0x1d   :  { %171 = vperm.xlu1 %1253, %v1435_v2  }
  0x1e   :  { %1135 = vmatpush3.bf16.msra.mxu0 %v1132_v21 }
  0x1f   :  { %1137 = vmatprep.subr.bf16.mxu0 %v1136_v24 }
  0x20   :  { %66 = vperm.xlu0 %1251, %v1457_v6  }
  0x21   :  { %175 = vperm.xlu1 %1253, %v1442_v3  }
  0x22   :  { %1139 = vmatpush3.bf16.msra.mxu0 %v1136_v24 }
  0x23   :  { %1141 = vmatprep.subr.bf16.mxu0 %v1140_v27 }
  0x24   :  { %81 = vperm.xlu0 %1251, %v1464_v7  }
  0x25   :  { %1254 = vset.pattern.permute.xlu1 %v1373_v8 }
  0x26   :  { %224 = vperm.xlu1 %1254, %v1435_v2   ;;  %1143 = vmatpush3.bf16.msra.mxu0 %v1140_v27 }
  0x27   :  { %1145 = vmatprep.subr.bf16.mxu0 %v1144_v30 }
  0x28   :  { %1264 = vset.pattern.permute.xlu0 %v1373_v8 }
  0x29   :  { %228 = vperm.xlu0 %1264, %v1442_v3  }
  0x2a   :  { %1255 = vset.pattern.permute.xlu1 %v1370_v0  ;;  %1147 = vmatpush3.bf16.msra.mxu0 %v1144_v30 }
  0x2b   :  { %130 = vperm.xlu1 %1255, %v1457_v6   ;;  %1149 = vmatprep.subr.bf16.mxu0 %v1148_v33 }
  0x2d   :  { %232 = vperm.xlu0 %1264, %v1449_v4  }
  0x2e   :  { %1151 = vmatpush3.bf16.msra.mxu0 %v1148_v33 }
  0x2f   :  { %1256 = vset.pattern.permute.xlu1 %v1371_v1  ;;  %1153 = vmatprep.subr.bf16.mxu0 %v1152_v36 }
  0x30   :  { %71 = vperm.xlu1 %1256, %v1477_v9  }
  0x31   :  { %236 = vperm.xlu0 %1264, %v1457_v6  }
  0x32   :  { %1155 = vmatpush3.bf16.msra.mxu0 %v1152_v36 }
  0x33   :  { %1157 = vmatprep.subr.bf16.mxu0 %v1156_v39 }
  0x34   :  { %1257 = vset.pattern.permute.xlu1 %v1372_v5 }
  0x35   :  { %179 = vperm.xlu1 %1257, %v1449_v4   ;;  %240 = vperm.xlu0 %1264, %v1477_v9  }
  0x36   :  { %1159 = vmatpush3.bf16.msra.mxu0 %v1156_v39 }
  0x39   :  { %1258 = vset.pattern.permute.xlu1 %v1371_v1  ;;  %1271 = vset.pattern.permute.xlu0 %v1370_v0 }
  0x3a   :  { %76 = vperm.xlu1 %1258, %v1488_v10   ;;  %126 = vperm.xlu0 %1271, %v1449_v4  }
  0x3e   :  { %1259 = vset.pattern.permute.xlu1 %v1372_v5  ;;  %146 = vperm.xlu0 %1271, %v1497_v11  }
  0x3f   :  { %183 = vperm.xlu1 %1259, %v1457_v6  }
  0x42   :  { %1276 = vset.pattern.permute.xlu0 %v1374_v12 }
  0x43   :  { %1260 = vset.pattern.permute.xlu1 %v1370_v0  ;;  %440 = vperm.xlu0 %1276, %v1442_v3  }
  0x44   :  { %134 = vperm.xlu1 %1260, %v1477_v9  }
  0x47   :  { %1277 = vset.pattern.permute.xlu0 %v1375_v13 }
  0x48   :  { %1261 = vset.pattern.permute.xlu1 %v1376_v14  ;;  %277 = vperm.xlu0 %1277, %v1435_v2  }
  0x49   :  { %330 = vperm.xlu1 %1261, %v1435_v2  }
  0x4c   :  { %281 = vperm.xlu0 %1277, %v1442_v3  }
  0x4d   :  { %1262 = vset.pattern.permute.xlu1 %v1370_v0 }
  0x4e   :  { %138 = vperm.xlu1 %1262, %v1488_v10  }
  0x50   :  { %289 = vperm.xlu0 %1277, %v1457_v6  }
  0x52   :  { %1263 = vset.pattern.permute.xlu1 %v1376_v14 }
  0x53   :  { %334 = vperm.xlu1 %1263, %v1442_v3  }
  0x54   :  { %301 = vperm.xlu0 %1277, %v1464_v7  }
  0x57   :  { %1265 = vset.pattern.permute.xlu1 %v1372_v5 }
  0x58   :  { %187 = vperm.xlu1 %1265, %v1477_v9   ;;  %1286 = vset.pattern.permute.xlu0 %v1376_v14 }
  0x59   :  { %346 = vperm.xlu0 %1286, %v1477_v9  }
  0x5c   :  { %1266 = vset.pattern.permute.xlu1 %v1375_v13 }
  0x5d   :  { %285 = vperm.xlu1 %1266, %v1449_v4   ;;  %350 = vperm.xlu0 %1286, %v1488_v10  }
  0x61   :  { %1267 = vset.pattern.permute.xlu1 %v1371_v1  ;;  %358 = vperm.xlu0 %1286, %v1497_v11  }
  0x62   :  { %86 = vperm.xlu1 %1267, %v1497_v11  }
  0x65   :  { %1291 = vset.pattern.permute.xlu0 %v1377_v15 }
  0x66   :  { %1268 = vset.pattern.permute.xlu1 %v1372_v5  ;;  %383 = vperm.xlu0 %1291, %v1435_v2  }
  0x67   :  { %191 = vperm.xlu1 %1268, %v1488_v10  }
  0x6a   :  { %391 = vperm.xlu0 %1291, %v1449_v4  }
  0x6b   :  { %1269 = vset.pattern.permute.xlu1 %v1377_v15 }
  0x6c   :  { %387 = vperm.xlu1 %1269, %v1442_v3  }
  0x6e   :  { %395 = vperm.xlu0 %1291, %v1457_v6  }
  0x70   :  { %1270 = vset.pattern.permute.xlu1 %v1370_v0 }
  0x71   :  { %142 = vperm.xlu1 %1270, %v1464_v7  }
  0x72   :  { %403 = vperm.xlu0 %1291, %v1488_v10  }
  0x75   :  { %1272 = vset.pattern.permute.xlu1 %v1376_v14 }
  0x76   :  { %338 = vperm.xlu1 %1272, %v1449_v4   ;;  %411 = vperm.xlu0 %1291, %v1497_v11  }
  0x7a   :  { %1273 = vset.pattern.permute.xlu1 %v1374_v12  ;;  %1294 = vset.pattern.permute.xlu0 %v1374_v12 }
  0x7b   :  { %436 = vperm.xlu1 %1273, %v1435_v2  }
  0x7f   :  { %1274 = vset.pattern.permute.xlu1 %v1373_v8 }
  0x80   :  { %244 = vperm.xlu1 %1274, %v1488_v10  }
  0x84   :  { %1275 = vset.pattern.permute.xlu1 %v1376_v14 }
  0x85   :  { %342 = vperm.xlu1 %1275, %v1457_v6  }
  0x89   :  { %1278 = vset.pattern.permute.xlu1 %v1372_v5 }
  0x8a   :  { %195 = vperm.xlu1 %1278, %v1464_v7  }
  0x8e   :  { %1279 = vset.pattern.permute.xlu1 %v1375_v13 }
  0x8f   :  { %293 = vperm.xlu1 %1279, %v1477_v9  }
  0x93   :  { %1280 = vset.pattern.permute.xlu1 %v1372_v5  ;;  %v119_v42 = vpop.permute.xlu1 %118  ;;  %v52_v44 = vpop.permute.xlu0 %51 }
  0x94   :  { %v93_v45 = vmul.f32 %v1555_v40, %v52_v44  ;;  %199 = vperm.xlu1 %1280, %v1497_v11   ;;  %v153_v46 = vmul.f32 %v1561_v41, %v119_v42 }
  0x96   :  { %v108_v47 = vadd.f32 %v1566_v43, %v93_v45 }
  0x97   :  { %v1572_v48 = vpop.permute.xlu1 %122  ;;  %v1574_v49 = vpop.permute.xlu0 %56 }
  0x98   :  { %1281 = vset.pattern.permute.xlu1 %v1375_v13  ;;  %v161_v50 = vadd.f32 %v153_v46, %v108_v47 }
  0x99   :  { %297 = vperm.xlu1 %1281, %v1488_v10  }
  0x9b   :  { %v62_v52 = vpop.permute.xlu0 %61 }
  0x9c   :  { %v172_v53 = vpop.permute.xlu1 %171  ;;  %v95_v5 = vmul.f32 %v1555_v40, %v62_v52 }
  0x9d   :  { %v206_v54 = vmul.f32 %v1581_v51, %v172_v53  ;;  %1282 = vset.pattern.permute.xlu1 %v1373_v8 }
  0x9e   :  { %248 = vperm.xlu1 %1282, %v1464_v7   ;;  %v110_v17 = vadd.f32 %v1566_v43, %v95_v5  ;;  %v635_v5 = vld [vmem:[#allocation2 + $0x98] sm:$0xff] }
  0x9f   :  { %v1586_v55 = vadd.f32 %v206_v54, %v161_v50  ;;  %v67_v56 = vpop.permute.xlu0 %66 }
  0xa0   :  { %v1588_v57 = vpop.permute.xlu1 %175  ;;  %v96_v59 = vmul.f32 %v1555_v40, %v67_v56 }
  0xa2   :  { %1283 = vset.pattern.permute.xlu1 %v1374_v12  ;;  %v111_v62 = vadd.f32 %v1566_v43, %v96_v59 }
  0xa3   :  { %444 = vperm.xlu1 %1283, %v1449_v4   ;;  %v1592_v58 = vpop.permute.xlu0 %81 }
  0xa5   :  { %v1595_v60 = vpop.permute.xlu1 %224 }
  0xa7   :  { %1284 = vset.pattern.permute.xlu1 %v1373_v8 }
  0xa8   :  { %252 = vperm.xlu1 %1284, %v1497_v11   ;;  %v1599_v61 = vpop.permute.xlu0 %228 }
  0xaa   :  { %v131_v63 = vpop.permute.xlu1 %130 }
  0xab   :  { %v156_v0 = vmul.f32 %v1561_v41, %v131_v63 }
  0xac   :  { %1285 = vset.pattern.permute.xlu1 %v1374_v12  ;;  %v233_v1 = vpop.permute.xlu0 %232 }
  0xad   :  { %v164_v2 = vadd.f32 %v156_v0, %v111_v62  ;;  %448 = vperm.xlu1 %1285, %v1457_v6   ;;  %v261_v21 = vmul.f32 %v1615_v20, %v233_v1 }
  0xaf   :  { %v72_v3 = vpop.permute.xlu1 %71 }
  0xb0   :  { %v237_v4 = vpop.permute.xlu0 %236  ;;  %v97_v28 = vmul.f32 %v1555_v40, %v72_v3  ;;  %v634_v3 = vld [vmem:[#allocation2 + $0x90] sm:$0xff] }
  0xb1   :  { %1287 = vset.pattern.permute.xlu1 %v1377_v15  ;;  %v262_v26 = vmul.f32 %v1615_v20, %v237_v4 }
  0xb2   :  { %399 = vperm.xlu1 %1287, %v1477_v9   ;;  %v112_v33 = vadd.f32 %v1566_v43, %v97_v28 }
  0xb4   :  { %v180_v8 = vpop.permute.xlu1 %179  ;;  %v241_v16 = vpop.permute.xlu0 %240 }
  0xb5   :  { %v208_v22 = vmul.f32 %v1581_v51, %v180_v8  ;;  %v263_v53 = vmul.f32 %v1615_v20, %v241_v16  ;;  %v1164_v16 = vpack.c.bf16 %v635_v5, %v634_v3 }
  0xb6   :  { %1288 = vset.pattern.permute.xlu1 %v1375_v13 }
  0xb7   :  { %305 = vperm.xlu1 %1288, %v1497_v11  }
  0xb9   :  { %v77_v18 = vpop.permute.xlu1 %76  ;;  %v127_v19 = vpop.permute.xlu0 %126 }
  0xba   :  { %v155_v6 = vmul.f32 %v1561_v41, %v127_v19  ;;  %v98_v38 = vmul.f32 %v1555_v40, %v77_v18  ;;  %v637_v18 = vld [vmem:[#allocation2 + $0xa8] sm:$0xff]  ;;  %v94_v19 = vmul.f32 %v1555_v40, %v1574_v49  ;;  %v99_v49 = vmul.f32 %v1555_v40, %v1592_v58 }
  0xbb   :  { %1289 = vset.pattern.permute.xlu1 %v1376_v14 }
  0xbc   :  { %v163_v13 = vadd.f32 %v155_v6, %v110_v17  ;;  %354 = vperm.xlu1 %1289, %v1464_v7   ;;  %v113_v42 = vadd.f32 %v1566_v43, %v98_v38  ;;  %v636_v17 = vld [vmem:[#allocation2 + $0xa0] sm:$0xff]  ;;  %v114_v38 = vadd.f32 %v1566_v43, %v99_v49 }
  0xbd   :  { %v147_v23 = vpop.permute.xlu0 %146 }
  0xbe   :  { %v216_v24 = vadd.f32 %v208_v22, %v163_v13  ;;  %v184_v25 = vpop.permute.xlu1 %183  ;;  %v160_v63 = vmul.f32 %v1561_v41, %v147_v23  ;;  %v1168_v13 = vpack.c.bf16 %v637_v18, %v636_v17 }
  0xbf   :  { %v209_v27 = vmul.f32 %v1581_v51, %v184_v25  ;;  %v639_v25 = vld [vmem:[#allocation2 + $0xb8] sm:$0xff] }
  0xc0   :  { %1290 = vset.pattern.permute.xlu1 %v1374_v12  ;;  %v1625_v29 = vadd.f32 %v261_v21, %v216_v24  ;;  %v638_v24 = vld [vmem:[#allocation2 + $0xb0] sm:$0xff] }
  0xc1   :  { %v217_v14 = vadd.f32 %v209_v27, %v164_v2  ;;  %452 = vperm.xlu1 %1290, %v1477_v9   ;;  %v633_v2 = vld [vmem:[#allocation2 + $0x88] sm:$0xff]  ;;  %v109_v27 = vadd.f32 %v1566_v43, %v94_v19 }
  0xc2   :  { %v1628_v30 = vpop.permute.xlu0 %440 }
  0xc3   :  { %v135_v31 = vpop.permute.xlu1 %134  ;;  %v270_v32 = vadd.f32 %v262_v26, %v217_v14  ;;  %v1172_v14 = vpack.c.bf16 %v639_v25, %v638_v24 }
  0xc4   :  { %v157_v34 = vmul.f32 %v1561_v41, %v135_v31  ;;  %v154_v31 = vmul.f32 %v1561_v41, %v1572_v48 }
  0xc5   :  { %456 = vperm.xlu1 %1290, %v1488_v10   ;;  %v1646_v10 = vld [vmem:[%s1845_s1 + $0x4] ss:$0 sm:$0xff] }
  0xc6   :  { %v165_v35 = vadd.f32 %v157_v34, %v112_v33  ;;  %v162_v33 = vadd.f32 %v154_v31, %v109_v27  ;;  %v260_v34 = vmul.f32 %v1615_v20, %v1599_v61  ;;  %v1695_v61 = vld [vmem:[%s1845_s1 + $0x5] ss:$0 sm:$0xff] }
  0xc7   :  { %v1633_v36 = vpop.permute.xlu0 %277 }
  0xc8   :  { %v1635_v37 = vpop.permute.xlu1 %330 }
  0xc9   :  { %1292 = vset.pattern.permute.xlu1 %v1377_v15 }
  0xca   :  { %407 = vperm.xlu1 %1292, %v1464_v7  }
  0xcb   :  { %v282_v9 = vpop.permute.xlu0 %281 }
  0xcd   :  { %v139_v39 = vpop.permute.xlu1 %138 }
  0xce   :  { %v158_v44 = vmul.f32 %v1561_v41, %v139_v39  ;;  %1293 = vset.pattern.permute.xlu1 %v1374_v12  ;;  %v313_v39 = vmul.f32 %v1646_v10, %v282_v9  ;;  %v1703_v9 = vld [vmem:[%s1845_s1 + $0x6] ss:$0 sm:$0xff] }
  0xcf   :  { %460 = vperm.xlu1 %1293, %v1464_v7   ;;  %v290_v15 = vpop.permute.xlu0 %289 }
  0xd0   :  { %v166_v45 = vadd.f32 %v158_v44, %v113_v42  ;;  %v315_v46 = vmul.f32 %v1646_v10, %v290_v15 }
  0xd2   :  { %v1650_v47 = vadd.f32 %v315_v46, %v270_v32  ;;  %v335_v50 = vpop.permute.xlu1 %334  ;;  %v207_v32 = vmul.f32 %v1581_v51, %v1588_v57  ;;  %v312_v57 = vmul.f32 %v1646_v10, %v1633_v36 }
  0xd3   :  { %464 = vperm.xlu1 %1293, %v1497_v11   ;;  %v1655_v56 = vpop.permute.xlu0 %301  ;;  %v632_v11 = vld [vmem:[#allocation2 + $0x80] sm:$0xff] }
  0xd4   :  { %v1160_v4 = vpack.c.bf16 %v633_v2, %v632_v11  ;;  %v215_v58 = vadd.f32 %v207_v32, %v162_v33 }
  0xd6   :  { %1161 = vmatprep.subr.bf16.mxu1 %v1160_v4  ;;  %v268_v44 = vadd.f32 %v260_v34, %v215_v58 }
  0xd7   :  { %v188_v52 = vpop.permute.xlu1 %187  ;;  %1163 = vmatpush3.bf16.msra.mxu1 %v1160_v4 }
  0xd8   :  { %v210_v12 = vmul.f32 %v1581_v51, %v188_v52  ;;  %v1662_v0 = vpop.permute.xlu0 %346  ;;  %1165 = vmatprep.subr.bf16.mxu1 %v1164_v16  ;;  %v321_v36 = vadd.f32 %v313_v39, %v268_v44 }
  0xda   :  { %v218_v54 = vadd.f32 %v210_v12, %v165_v35 }
  0xdb   :  { %1167 = vmatpush3.bf16.msra.mxu1 %v1164_v16 }
  0xdc   :  { %v1657_v59 = vpop.permute.xlu1 %285  ;;  %v1659_v7 = vadd.f32 %v263_v53, %v218_v54  ;;  %v1671_v23 = vpop.permute.xlu0 %350  ;;  %1169 = vmatprep.subr.bf16.mxu1 %v1168_v13 }
  0xdd   :  { %v314_v27 = vmul.f32 %v1646_v10, %v1657_v59  ;;  %v370_v49 = vmul.f32 %v1695_v61, %v1671_v23  ;;  %v318_v59 = vmul.f32 %v1646_v10, %v1655_v56 }
  0xdf   :  { %1171 = vmatpush3.bf16.msra.mxu1 %v1168_v13  ;;  %v322_v33 = vadd.f32 %v314_v27, %v1625_v29 }
  0xe0   :  { %v1684_v35 = vpop.permute.xlu0 %358  ;;  %1173 = vmatprep.subr.bf16.mxu1 %v1172_v14 }
  0xe1   :  { %v87_v62 = vpop.permute.xlu1 %86 }
  0xe2   :  { %v100_v1 = vmul.f32 %v1555_v40, %v87_v62  ;;  %v259_v40 = vmul.f32 %v1615_v20, %v1595_v60 }
  0xe3   :  { %1175 = vmatpush3.bf16.msra.mxu1 %v1172_v14 }
  0xe4   :  { %v115_v8 = vadd.f32 %v1566_v43, %v100_v1  ;;  %v366_v43 = vmul.f32 %v1695_v61, %v335_v50  ;;  %v267_v60 = vadd.f32 %v259_v40, %v1586_v55  ;;  %v365_v50 = vmul.f32 %v1695_v61, %v1635_v37 }
  0xe6   :  { %v192_v6 = vpop.permute.xlu1 %191  ;;  %v1668_v21 = vadd.f32 %v160_v63, %v115_v8  ;;  %v320_v52 = vadd.f32 %v312_v57, %v267_v60  ;;  %v374_v53 = vadd.f32 %v366_v43, %v321_v36 }
  0xe7   :  { %v211_v22 = vmul.f32 %v1581_v51, %v192_v6 }
  0xe8   :  { %v373_v63 = vadd.f32 %v365_v50, %v320_v52 }
  0xe9   :  { %v1673_v26 = vadd.f32 %v211_v22, %v166_v45  ;;  %v384_v45 = vpop.permute.xlu0 %383 }
  0xea   :  { %v418_v12 = vmul.f32 %v1703_v9, %v384_v45 }
  0xeb   :  { %v388_v28 = vpop.permute.xlu1 %387 }
  0xec   :  { %v419_v46 = vmul.f32 %v1703_v9, %v388_v28  ;;  %v426_v11 = vadd.f32 %v418_v12, %v373_v63 }
  0xed   :  { %v392_v32 = vpop.permute.xlu0 %391 }
  0xee   :  { %v427_v62 = vadd.f32 %v419_v46, %v374_v53 }
  0xf0   :  { %v143_v48 = vpop.permute.xlu1 %142 }
  0xf1   :  { %v159_v42 = vmul.f32 %v1561_v41, %v143_v48  ;;  %v1709_v41 = vld [vmem:[%s1845_s1 + $0x7] ss:$0 sm:$0xff]  ;;  %v396_v60 = vpop.permute.xlu0 %395 }
  0xf2   :  { %v472_v54 = vmul.f32 %v1709_v41, %v1628_v30  ;;  %v369_v30 = vmul.f32 %v1695_v61, %v1662_v0 }
  0xf3   :  { %v167_v15 = vadd.f32 %v159_v42, %v114_v38 }
  0xf4   :  { %v480_v3 = vadd.f32 %v472_v54, %v427_v62 }
  0xf5   :  { %v339_v55 = vpop.permute.xlu1 %338 }
  0xf6   :  { %v367_v31 = vmul.f32 %v1695_v61, %v339_v55 }
  0xf8   :  { %v375_v58 = vadd.f32 %v367_v31, %v322_v33 }
  0xfa   :  { %v437_v1 = vpop.permute.xlu1 %436 }
  0xfb   :  { %v471_v2 = vmul.f32 %v1709_v41, %v437_v1 }
  0xfd   :  { %v479_v4 = vadd.f32 %v471_v2, %v426_v11  ;;  %v372_v11 = vmul.f32 %v1695_v61, %v1684_v35 }
  0xff   :  { %v245_v5 = vpop.permute.xlu1 %244  ;;  %1295 = vtanh.f32 %v479_v4 }
 0x100   :  { %1297 = vtanh.f32 %v480_v3  ;;  %v264_v24 = vmul.f32 %v1615_v20, %v245_v5 }
 0x102   :  { %v272_v28 = vadd.f32 %v264_v24, %v1673_v26  ;;  %v420_v26 = vmul.f32 %v1703_v9, %v392_v32 }
 0x104   :  { %v343_v8 = vpop.permute.xlu1 %342  ;;  %v428_v42 = vadd.f32 %v420_v26, %v375_v58 }
 0x105   :  { %v368_v43 = vmul.f32 %v1695_v61, %v343_v8  ;;  %v404_v8 = vpop.permute.xlu0 %403 }
 0x107   :  { %v376_v56 = vadd.f32 %v368_v43, %v1650_v47  ;;  %v769_v43 = vld [vmem:[%s1849_s5] sm:$0xff] }
 0x109   :  { %v1296_v37 = vpop.eup %1295  ;;  %v196_v16 = vpop.permute.xlu1 %195 }
 0x10a   :  { %v1298_v17 = vpop.eup %1297  ;;  %1028 = vmatprep.mubr.f32.mxu0 %v1296_v37  ;;  %v212_v0 = vmul.f32 %v1581_v51, %v196_v16  ;;  %v412_v24 = vpop.permute.xlu0 %411 }
 0x10b   :  { %1029 = vmatmul.mubr.f32.vlgmr.msra.gmra.mrb[0].mxu0 %v1298_v17 }
 0x10c   :  { %v220_v40 = vadd.f32 %v212_v0, %v167_v15  ;;  %v421_v15 = vmul.f32 %v1703_v9, %v396_v60  ;;  %v771_v60 = vld [vmem:[%s1849_s5 + $0x10] sm:$0xff] }
 0x10e   :  { %v294_v18 = vpop.permute.xlu1 %293  ;;  %v429_v46 = vadd.f32 %v421_v15, %v376_v56  ;;  %v772_v56 = vld [vmem:[%s1849_s5 + $0x18] sm:$0xff] }
 0x10f   :  { %v316_v19 = vmul.f32 %v1646_v10, %v294_v18  ;;  %v1196_v15 = vpack.c.bf16 %v772_v56, %v771_v60 }
 0x111   :  { %v324_v6 = vadd.f32 %v316_v19, %v1659_v7 }
 0x113   :  { %v200_v22 = vpop.permute.xlu1 %199  ;;  %v377_v13 = vadd.f32 %v369_v30, %v324_v6 }
 0x114   :  { %v213_v53 = vmul.f32 %v1581_v51, %v200_v22 }
 0x116   :  { %v221_v62 = vadd.f32 %v213_v53, %v1668_v21 }
 0x118   :  { %v298_v25 = vpop.permute.xlu1 %297 }
 0x119   :  { %v317_v14 = vmul.f32 %v1646_v10, %v298_v25 }
 0x11b   :  { %v325_v7 = vadd.f32 %v317_v14, %v272_v28 }
 0x11d   :  { %v378_v34 = vadd.f32 %v370_v49, %v325_v7  ;;  %v249_v38 = vpop.permute.xlu1 %248 }
 0x11e   :  { %v265_v23 = vmul.f32 %v1615_v20, %v249_v38  ;;  %v641_v38 = vld [vmem:[#allocation2 + $0xc8] sm:$0xff] }
 0x120   :  { %v273_v39 = vadd.f32 %v265_v23, %v220_v40  ;;  %v643_v23 = vld [vmem:[#allocation2 + $0xd8] sm:$0xff] }
 0x122   :  { %v445_v48 = vpop.permute.xlu1 %444  ;;  %v326_v57 = vadd.f32 %v318_v59, %v273_v39  ;;  %v644_v39 = vld [vmem:[#allocation2 + $0xe0] sm:$0xff] }
 0x123   :  { %v473_v44 = vmul.f32 %v1709_v41, %v445_v48  ;;  %v645_v48 = vld [vmem:[#allocation2 + $0xe8] sm:$0xff] }
 0x125   :  { %v481_v29 = vadd.f32 %v473_v44, %v428_v42  ;;  %v647_v42 = vld [vmem:[#allocation2 + $0xf8] sm:$0xff] }
 0x127   :  { %1299 = vtanh.f32 %v481_v29  ;;  %v253_v36 = vpop.permute.xlu1 %252  ;;  %v770_v29 = vld [vmem:[%s1849_s5 + $0x8] sm:$0xff] }
 0x128   :  { %v266_v54 = vmul.f32 %v1615_v20, %v253_v36  ;;  %v423_v20 = vmul.f32 %v1703_v9, %v404_v8  ;;  %v1192_v36 = vpack.c.bf16 %v770_v29, %v769_v43 }
 0x12a   :  { %v274_v1 = vadd.f32 %v266_v54, %v221_v62  ;;  %1193 = vmatprep.subr.bf16.mxu0 %v1192_v36 }
 0x12b   :  { %1195 = vmatpush3.bf16.msra.mxu0 %v1192_v36 }
 0x12c   :  { %v449_v45 = vpop.permute.xlu1 %448  ;;  %1197 = vmatprep.subr.bf16.mxu0 %v1196_v15 }
 0x12d   :  { %v474_v52 = vmul.f32 %v1709_v41, %v449_v45  ;;  %v773_v45 = vld [vmem:[%s1849_s5 + $0x20] sm:$0xff] }
 0x12f   :  { %v482_v50 = vadd.f32 %v474_v52, %v429_v46  ;;  %v774_v46 = vld [vmem:[%s1849_s5 + $0x28] sm:$0xff]  ;;  %1199 = vmatpush3.bf16.msra.mxu0 %v1196_v15 }
 0x130   :  { %v1200_v52 = vpack.c.bf16 %v774_v46, %v773_v45 }
 0x131   :  { %v1300_v55 = vpop.eup %1299  ;;  %1301 = vtanh.f32 %v482_v50  ;;  %v400_v12 = vpop.permute.xlu1 %399  ;;  %v775_v50 = vld [vmem:[%s1849_s5 + $0x30] sm:$0xff] }
 0x132   :  { %1031 = vmatprep.mubr.f32.mxu0 %v1300_v55  ;;  %v422_v51 = vmul.f32 %v1703_v9, %v400_v12  ;;  %v776_v55 = vld [vmem:[%s1849_s5 + $0x38] sm:$0xff]  ;;  %1201 = vmatprep.subr.bf16.mxu0 %v1200_v52  ;;  %v920_v12 = vld [vmem:[%s1848_s4] ss:$0 sm:$0xff] }
 0x133   :  { %v1204_v53 = vpack.c.bf16 %v776_v55, %v775_v50  ;;  %1203 = vmatpush3.bf16.msra.mxu0 %v1200_v52  ;;  %v923_v55 = vld [vmem:[%s1850_s6] ss:$0 sm:$0xff] }
 0x134   :  { %v430_v16 = vadd.f32 %v422_v51, %v377_v13  ;;  %v425_v13 = vmul.f32 %v1703_v9, %v412_v24 }
 0x135   :  { %1205 = vmatprep.subr.bf16.mxu0 %v1204_v53 }
 0x136   :  { %v306_v63 = vpop.permute.xlu1 %305 }
 0x137   :  { %v319_v47 = vmul.f32 %v1646_v10, %v306_v63  ;;  %v431_v10 = vadd.f32 %v423_v20, %v378_v34  ;;  %v640_v34 = vld [vmem:[#allocation2 + $0xc0] sm:$0xff]  ;;  %1207 = vmatpush3.bf16.msra.mxu0 %v1204_v53 }
 0x138   :  { %v1176_v59 = vpack.c.bf16 %v641_v38, %v640_v34 }
 0x139   :  { %v327_v2 = vadd.f32 %v319_v47, %v274_v1 }
 0x13a   :  { %1177 = vmatprep.subr.bf16.mxu1 %v1176_v59 }
 0x13b   :  { %v1302_v3 = vpop.eup %1301  ;;  %v380_v4 = vadd.f32 %v372_v11, %v327_v2  ;;  %v355_v5 = vpop.permute.xlu1 %354  ;;  %1179 = vmatpush3.bf16.msra.mxu1 %v1176_v59 }
 0x13c   :  { %1032 = vmatmul.mubr.f32.gmra.mrb[2].mxu0 %v1302_v3  ;;  %v371_v19 = vmul.f32 %v1695_v61, %v355_v5 }
 0x13d   :  { %v433_v32 = vadd.f32 %v425_v13, %v380_v4 }
 0x13e   :  { %v379_v25 = vadd.f32 %v371_v19, %v326_v57  ;;  %v646_v57 = vld [vmem:[#allocation2 + $0xf0] sm:$0xff] }
 0x13f   :  { %v1188_v44 = vpack.c.bf16 %v647_v42, %v646_v57 }
 0x140   :  { %v453_v37 = vpop.permute.xlu1 %452 }
 0x141   :  { %v475_v21 = vmul.f32 %v1709_v41, %v453_v37 }
 0x143   :  { %v483_v17 = vadd.f32 %v475_v21, %v430_v16 }
 0x144   :  { %v457_v18 = vpop.permute.xlu1 %456 }
 0x145   :  { %1303 = vtanh.f32 %v483_v17  ;;  %v476_v35 = vmul.f32 %v1709_v41, %v457_v18 }
 0x147   :  { %v484_v30 = vadd.f32 %v476_v35, %v431_v10 }
 0x149   :  { %1305 = vtanh.f32 %v484_v30  ;;  %v408_v6 = vpop.permute.xlu1 %407 }
 0x14a   :  { %v424_v22 = vmul.f32 %v1703_v9, %v408_v6  ;;  %v642_v9 = vld [vmem:[#allocation2 + $0xd0] sm:$0xff]  ;;  %v777_v6 = vld [vmem:[%s1849_s5 + $0x40] sm:$0xff] }
 0x14b   :  { %v1180_v58 = vpack.c.bf16 %v643_v23, %v642_v9 }
 0x14c   :  { %v432_v28 = vadd.f32 %v424_v22, %v379_v25  ;;  %v778_v22 = vld [vmem:[%s1849_s5 + $0x48] sm:$0xff]  ;;  %v779_v25 = vld [vmem:[%s1849_s5 + $0x50] sm:$0xff] }
 0x14d   :  { %1181 = vmatprep.subr.bf16.mxu1 %v1180_v58  ;;  %v1208_v24 = vpack.c.bf16 %v778_v22, %v777_v6 }
 0x14e   :  { %v461_v27 = vpop.permute.xlu1 %460  ;;  %1183 = vmatpush3.bf16.msra.mxu1 %v1180_v58 }
 0x14f   :  { %v1304_v49 = vpop.eup %1303  ;;  %v477_v14 = vmul.f32 %v1709_v41, %v461_v27  ;;  %1209 = vmatprep.subr.bf16.mxu0 %v1208_v24  ;;  %v780_v27 = vld [vmem:[%s1849_s5 + $0x58] sm:$0xff] }
 0x150   :  { %1034 = vmatprep.mubr.f32.mxu0 %v1304_v49  ;;  %1211 = vmatpush3.bf16.msra.mxu0 %v1208_v24  ;;  %v1212_v13 = vpack.c.bf16 %v780_v27, %v779_v25 }
 0x151   :  { %v485_v0 = vadd.f32 %v477_v14, %v432_v28  ;;  %v781_v14 = vld [vmem:[%s1849_s5 + $0x60] sm:$0xff] }
 0x152   :  { %v465_v31 = vpop.permute.xlu1 %464  ;;  %1213 = vmatprep.subr.bf16.mxu0 %v1212_v13 }
 0x153   :  { %v1306_v7 = vpop.eup %1305  ;;  %1307 = vtanh.f32 %v485_v0  ;;  %v478_v61 = vmul.f32 %v1709_v41, %v465_v31  ;;  %v1184_v41 = vpack.c.bf16 %v645_v48, %v644_v39  ;;  %v782_v0 = vld [vmem:[%s1849_s5 + $0x68] sm:$0xff]  ;;  %v783_v31 = vld [vmem:[%s1849_s5 + $0x70] sm:$0xff] }
 0x154   :  { %1035 = vmatmul.mubr.f32.gmra.mrb[4].mxu0 %v1306_v7  ;;  %v1216_v7 = vpack.c.bf16 %v782_v0, %v781_v14 }
 0x155   :  { %v486_v33 = vadd.f32 %v478_v61, %v433_v32  ;;  %1185 = vmatprep.subr.bf16.mxu1 %v1184_v41  ;;  %1215 = vmatpush3.bf16.msra.mxu0 %v1212_v13  ;;  %v784_v32 = vld [vmem:[%s1849_s5 + $0x78] sm:$0xff] }
 0x156   :  { %1187 = vmatpush3.bf16.msra.mxu1 %v1184_v41  ;;  %v1220_v61 = vpack.c.bf16 %v784_v32, %v783_v31  ;;  %1217 = vmatprep.subr.bf16.mxu0 %v1216_v7 }
 0x157   :  { %1309 = vtanh.f32 %v486_v33  ;;  %1189 = vmatprep.subr.bf16.mxu1 %v1188_v44  ;;  %v922_v33 = vld [vmem:[%s1848_s4 + $0x1] ss:$0 sm:$0xff] }
 0x159   :  { %1219 = vmatpush3.bf16.msra.mxu0 %v1216_v7 }
 0x15a   :  { %1191 = vmatpush3.bf16.msra.mxu1 %v1188_v44  ;;  %1221 = vmatprep.subr.bf16.mxu0 %v1220_v61 }
 0x15b   :  { %1224 = vmatprep.subr.bf16.mxu1 %v1192_v36 }
 0x15d   :  { %v1308_v40 = vpop.eup %1307  ;;  %1223 = vmatpush3.bf16.msra.mxu0 %v1220_v61 }
 0x15e   :  { %1037 = vmatprep.mubr.f32.mxu0 %v1308_v40 }
 0x161   :  { %v1310_v26 = vpop.eup %1309 }
 0x162   :  { %1038 = vmatmul.mubr.f32.gmra.mrb[6].mxu0 %v1310_v26 }
 0x1de   :  { %v1030_v54 = vpop.f32.mrb[0].mxu0 }
 0x1df   :  { %v590_v62 = vadd.f32 %v1030_v54, %v920_v12  ;;  %v584_v63 = vpop.f32.mrb[1].mxu0 }
 0x1e0   :  { %v585_v1 = vadd.f32 %v920_v12, %v584_v63 }
 0x1e2   :  { %1311 = vtanh.f32 %v585_v1 }
 0x1e3   :  { %1313 = vtanh.f32 %v590_v62 }
 0x1ec   :  { %v1312_v47 = vpop.eup %1311 }
 0x1ed   :  { %v1314_v11 = vpop.eup %1313  ;;  %1072 = vmatprep.mubr.f32.mxu1 %v1312_v47 }
 0x1ee   :  { %1073 = vmatmul.mubr.f32.vlgmr.msra.gmra.mrb[0].mxu1 %v1314_v11 }
 0x1ef   :  { %1232 = vmatpush3.bf16.msra.mxu1 %v1192_v36 }
 0x1f0   :  { %1225 = vmatprep.subr.bf16.mxu1 %v1196_v15 }
 0x1f3   :  { %1233 = vmatpush3.bf16.msra.mxu1 %v1196_v15 }
 0x1f4   :  { %1226 = vmatprep.subr.bf16.mxu1 %v1200_v52 }
 0x1f7   :  { %1234 = vmatpush3.bf16.msra.mxu1 %v1200_v52 }
 0x1f8   :  { %1227 = vmatprep.subr.bf16.mxu1 %v1204_v53 }
 0x1fb   :  { %1235 = vmatpush3.bf16.msra.mxu1 %v1204_v53 }
 0x1fc   :  { %1228 = vmatprep.subr.bf16.mxu1 %v1208_v24 }
 0x1ff   :  { %1236 = vmatpush3.bf16.msra.mxu1 %v1208_v24 }
 0x200   :  { %1229 = vmatprep.subr.bf16.mxu1 %v1212_v13 }
 0x203   :  { %1237 = vmatpush3.bf16.msra.mxu1 %v1212_v13 }
 0x204   :  { %1230 = vmatprep.subr.bf16.mxu1 %v1216_v7 }
 0x207   :  { %1238 = vmatpush3.bf16.msra.mxu1 %v1216_v7 }
 0x208   :  { %1231 = vmatprep.subr.bf16.mxu1 %v1220_v61 }
 0x20b   :  { %1239 = vmatpush3.bf16.msra.mxu1 %v1220_v61 }
 0x20f   :  { %v1033_v2 = vpop.f32.mrb[2].mxu0 }
 0x210   :  { %v600_v3 = vadd.f32 %v1033_v2, %v920_v12  ;;  %v594_v4 = vpop.f32.mrb[3].mxu0 }
 0x211   :  { %v595_v5 = vadd.f32 %v920_v12, %v594_v4 }
 0x213   :  { %1315 = vtanh.f32 %v595_v5 }
 0x214   :  { %1317 = vtanh.f32 %v600_v3 }
 0x21d   :  { %v1316_v51 = vpop.eup %1315 }
 0x21e   :  { %v1318_v8 = vpop.eup %1317  ;;  %1075 = vmatprep.mubr.f32.mxu1 %v1316_v51 }
 0x21f   :  { %1076 = vmatmul.mubr.f32.gmra.mrb[2].mxu1 %v1318_v8 }
 0x227   :  { %v1036_v37 = vpop.f32.mrb[4].mxu0 }
 0x228   :  { %v610_v20 = vadd.f32 %v1036_v37, %v920_v12  ;;  %v604_v16 = vpop.f32.mrb[5].mxu0 }
 0x229   :  { %v605_v21 = vadd.f32 %v920_v12, %v604_v16 }
 0x22b   :  { %1319 = vtanh.f32 %v605_v21 }
 0x22c   :  { %1321 = vtanh.f32 %v610_v20 }
 0x235   :  { %v1320_v17 = vpop.eup %1319  ;;  %v1039_v18 = vpop.f32.mrb[6].mxu0 }
 0x236   :  { %v1322_v10 = vpop.eup %1321  ;;  %v620_v35 = vadd.f32 %v1039_v18, %v920_v12  ;;  %v614_v30 = vpop.f32.mrb[7].mxu0  ;;  %1078 = vmatprep.mubr.f32.mxu1 %v1320_v17 }
 0x237   :  { %v615_v19 = vadd.f32 %v920_v12, %v614_v30  ;;  %1079 = vmatmul.mubr.f32.gmra.mrb[4].mxu1 %v1322_v10 }
 0x239   :  { %1323 = vtanh.f32 %v615_v19 }
 0x23a   :  { %1325 = vtanh.f32 %v620_v35 }
 0x243   :  { %v1324_v49 = vpop.eup %1323 }
 0x244   :  { %v1326_v28 = vpop.eup %1325  ;;  %1081 = vmatprep.mubr.f32.mxu1 %v1324_v49 }
 0x245   :  { %1082 = vmatmul.mubr.f32.gmra.mrb[6].mxu1 %v1326_v28 }
 0x2c1   :  { %v1074_v34 = vpop.f32.mrb[0].mxu1 }
 0x2c2   :  { %v728_v38 = vadd.f32 %v1074_v34, %v922_v33  ;;  %v722_v59 = vpop.f32.mrb[1].mxu1 }
 0x2c3   :  { %v723_v40 = vadd.f32 %v922_v33, %v722_v59 }
 0x2c5   :  { %1327 = vtanh.f32 %v723_v40 }
 0x2c6   :  { %1329 = vtanh.f32 %v728_v38 }
 0x2cf   :  { %v1328_v9 = vpop.eup %1327 }
 0x2d0   :  { %v1330_v23 = vpop.eup %1329  ;;  %1116 = vmatprep.mubr.f32.mxu0 %v1328_v9 }
 0x2d1   :  { %1117 = vmatmul.mubr.f32.vlgmr.msra.gmra.mrb[8].mxu0 %v1330_v23 }
 0x2f2   :  { %v1077_v58 = vpop.f32.mrb[2].mxu1 }
 0x2f3   :  { %v738_v26 = vadd.f32 %v1077_v58, %v922_v33  ;;  %v732_v39 = vpop.f32.mrb[3].mxu1 }
 0x2f4   :  { %v733_v48 = vadd.f32 %v922_v33, %v732_v39 }
 0x2f6   :  { %1331 = vtanh.f32 %v733_v48 }
 0x2f7   :  { %1333 = vtanh.f32 %v738_v26 }
 0x300   :  { %v1332_v57 = vpop.eup %1331 }
 0x301   :  { %v1334_v41 = vpop.eup %1333  ;;  %1119 = vmatprep.mubr.f32.mxu0 %v1332_v57 }
 0x302   :  { %1120 = vmatmul.mubr.f32.gmra.mrb[10].mxu0 %v1334_v41 }
 0x30a   :  { %v1080_v42 = vpop.f32.mrb[4].mxu1 }
 0x30b   :  { %v748_v44 = vadd.f32 %v1080_v42, %v922_v33  ;;  %v742_v43 = vpop.f32.mrb[5].mxu1 }
 0x30c   :  { %v743_v29 = vadd.f32 %v922_v33, %v742_v43 }
 0x30e   :  { %1335 = vtanh.f32 %v743_v29 }
 0x30f   :  { %1337 = vtanh.f32 %v748_v44 }
 0x318   :  { %v1336_v60 = vpop.eup %1335  ;;  %v1083_v36 = vpop.f32.mrb[6].mxu1 }
 0x319   :  { %v1338_v56 = vpop.eup %1337  ;;  %v758_v15 = vadd.f32 %v1083_v36, %v922_v33  ;;  %v752_v45 = vpop.f32.mrb[7].mxu1  ;;  %1122 = vmatprep.mubr.f32.mxu1 %v1336_v60 }
 0x31a   :  { %v753_v46 = vadd.f32 %v922_v33, %v752_v45  ;;  %1123 = vmatmul.mubr.f32.vlgmr.msra.gmra.mrb[8].mxu1 %v1338_v56 }
 0x31c   :  { %1339 = vtanh.f32 %v753_v46 }
 0x31d   :  { %1341 = vtanh.f32 %v758_v15 }
 0x326   :  { %v1340_v52 = vpop.eup %1339 }
 0x327   :  { %v1342_v50 = vpop.eup %1341  ;;  %1125 = vmatprep.mubr.f32.mxu1 %v1340_v52 }
 0x328   :  { %1126 = vmatmul.mubr.f32.gmra.mrb[10].mxu1 %v1342_v50 }
 0x3a4   :  { %v1118_v53 = vpop.f32.mrb[8].mxu0 }
 0x3a5   :  { %v864_v12 = vadd.f32 %v1118_v53, %v923_v55  ;;  %v858_v54 = vpop.f32.mrb[9].mxu0 }
 0x3a6   :  { %v859_v62 = vadd.f32 %v923_v55, %v858_v54 }
 0x3a7   :  { %899 = vst.msk [vmem:[%s1851_s7 + $0x8] sm:$0xff] %vm897_vm0, %v864_v12 }
 0x3a8   :  { %898 = vst.msk [vmem:[%s1851_s7] sm:$0xff] %vm897_vm0, %v859_v62 }
 0x3d5   :  { %v1121_v63 = vpop.f32.mrb[10].mxu0 }
 0x3d6   :  { %v874_v1 = vadd.f32 %v1121_v63, %v923_v55  ;;  %v868_v47 = vpop.f32.mrb[11].mxu0 }
 0x3d7   :  { %v869_v11 = vadd.f32 %v923_v55, %v868_v47 }
 0x3d8   :  { %901 = vst.msk [vmem:[%s1851_s7 + $0x18] sm:$0xff] %vm897_vm0, %v874_v1 }
 0x3d9   :  { %900 = vst.msk [vmem:[%s1851_s7 + $0x10] sm:$0xff] %vm897_vm0, %v869_v11 }
 0x3ed   :  { %v1124_v2 = vpop.f32.mrb[8].mxu1 }
 0x3ee   :  { %v884_v3 = vadd.f32 %v1124_v2, %v923_v55  ;;  %v878_v4 = vpop.f32.mrb[9].mxu1 }
 0x3ef   :  { %v879_v5 = vadd.f32 %v923_v55, %v878_v4 }
 0x3f0   :  { %903 = vst.msk [vmem:[%s1851_s7 + $0x28] sm:$0xff] %vm897_vm0, %v884_v3 }
 0x3f1   :  { %902 = vst.msk [vmem:[%s1851_s7 + $0x20] sm:$0xff] %vm897_vm0, %v879_v5 }
 0x3fb   :  { %v1127_v51 = vpop.f32.mrb[10].mxu1 }
 0x3fc   :  { %v894_v8 = vadd.f32 %v1127_v51, %v923_v55  ;;  %v888_v37 = vpop.f32.mrb[11].mxu1 }
 0x3fd   :  { %v889_v20 = vadd.f32 %v923_v55, %v888_v37 }
 0x3fe   :  { %905 = vst.msk [vmem:[%s1851_s7 + $0x38] sm:$0xff] %vm897_vm0, %v894_v8 }
 0x3ff   :  { %904 = vst.msk [vmem:[%s1851_s7 + $0x30] sm:$0xff] %vm897_vm0, %v889_v20 }
 0x400   :  { %910 = vsyncpa [#allocation3], 1 }

</bundles_post_ra>
